<compile_context>
chip_gen: v6e
topology: v6e:2x2x1
jax: 0.10.0
libtpu: 0.0.40
codegen_flags: <defaults>
</compile_context>

<pallas_src>
import math

import jax
import jax.numpy as jnp
from jax import lax
from jax.experimental import pallas as pl
from jax.experimental.pallas import tpu as pltpu

# ---- problem sizes (small, consistent with the module) -----------------------
B, S, D = 2, 8, 32          # batch, seq, d_model
H = 4                       # nhead
DH = D // H                 # head dim
DFF = 64                    # dim_feedforward
EPS = 1e-5                  # layer_norm_eps
BS = B * S                  # flattened token count
NEG = -1e30                 # finite "minus infinity" for masking


# ---- Pallas kernel: whole layer, whole batch, in one grid step ----------------
def cm2_layer_kernel(x_ref, bias_ref,
                     inw_ref, inb_ref, ow_ref, ob_ref,
                     n1g_ref, n1b_ref,
                     gate_ref, w1_ref, b1_ref, w2_ref, b2_ref,
                     n2g_ref, n2b_ref,
                     o_ref):
    x = x_ref[...].astype(jnp.float32)          # (BS, D)  batch flattened into rows
    attn_bias = bias_ref[...]                   # (BS, BS) 0 = attend, -1e30 = blocked

    # ---------------- QKV projection: one (BS, D) @ (D, 3D) matmul --------------
    qkv = jnp.dot(x, inw_ref[...], preferred_element_type=jnp.float32) + inb_ref[...]
    q = qkv[:, :D] * (1.0 / math.sqrt(DH))
    k = qkv[:, D:2 * D]
    v = qkv[:, 2 * D:]

    # ---------------- multi-head attention --------------------------------------
    # Batch is folded into the row dimension; cross-batch attention and padded keys
    # are suppressed by the single hoisted additive bias. Per-head contexts stay in
    # registers and are lane-concatenated for one fused output projection.
    ctx_parts = []
    for h in range(H):                           # static unroll over heads (H=4)
        sl = slice(h * DH, (h + 1) * DH)
        s = lax.dot_general(q[:, sl], k[:, sl], (((1,), (1,)), ((), ())),
                            preferred_element_type=jnp.float32)     # (BS, BS)
        s = s + attn_bias
        s = s - jnp.max(s, axis=-1, keepdims=True)
        p = jnp.exp(s)
        p = p * pl.reciprocal(jnp.sum(p, axis=-1, keepdims=True), approx=True)
        ctx_parts.append(jnp.dot(p, v[:, sl], preferred_element_type=jnp.float32))
    ctx = jnp.concatenate(ctx_parts, axis=-1)    # (BS, D)

    # single output projection over all heads: (BS, D) @ (D, D)
    attn_out = jnp.dot(ctx, ow_ref[...],
                       preferred_element_type=jnp.float32) + ob_ref[...]
    # TODO(synk): dropout / dropout1 / dropout2 are identity (eval-mode semantics).

    # ---------------- residual + LayerNorm1 --------------------------------------
    r1 = x + attn_out
    mu1 = jnp.mean(r1, axis=-1, keepdims=True)
    var1 = jnp.mean((r1 - mu1) ** 2, axis=-1, keepdims=True)
    x1 = (r1 - mu1) * lax.rsqrt(var1 + EPS) * n1g_ref[...] + n1b_ref[...]

    # ---------------- gated feed-forward ( _ff_block ) ---------------------------
    # gate logit as a VPU multiply + row reduction (no N=1 MXU matmul)
    g = jax.nn.sigmoid(jnp.sum(x1 * gate_ref[...], axis=-1, keepdims=True))      # (BS, 1)
    hid = jnp.dot(x1, w1_ref[...], preferred_element_type=jnp.float32) + b1_ref[...]
    hid = jnp.maximum(hid * g, 0.0)              # gate first, then ReLU (module order)
    ff = jnp.dot(hid, w2_ref[...], preferred_element_type=jnp.float32) + b2_ref[...]

    # ---------------- residual + LayerNorm2 --------------------------------------
    r2 = x1 + ff
    mu2 = jnp.mean(r2, axis=-1, keepdims=True)
    var2 = jnp.mean((r2 - mu2) ** 2, axis=-1, keepdims=True)
    out = (r2 - mu2) * lax.rsqrt(var2 + EPS) * n2g_ref[...] + n2b_ref[...]
    o_ref[...] = out.astype(o_ref.dtype)


# ---- wrapper ------------------------------------------------------------------
def cm2_transformer_layer(x, key_padding_mask, params):
    weights = [
        params["in_proj_wT"], params["in_proj_b"],
        params["out_proj_wT"], params["out_proj_b"],
        params["norm1_g"], params["norm1_b"],
        params["gate_wT"].reshape(1, D),     # row form for in-kernel VPU reduction
        params["w1T"], params["b1"],
        params["w2T"], params["b2"],
        params["norm2_g"], params["norm2_b"],
    ]

    # flatten batch into rows (free reshape on the XLA side)
    x2d = x.reshape(BS, D)

    # Precompute the additive attention bias once outside the kernel:
    # blocks (a) cross-batch attention (batch is folded into rows) and
    # (b) padded keys. Finite -1e30 instead of -inf avoids inf - inf = NaN.
    valid = key_padding_mask.astype(jnp.float32).reshape(B, S)
    keep = jnp.eye(B, dtype=jnp.float32)[:, :, None] * valid[None, :, :]   # (Bq, Bk, Sk)
    keep = jnp.broadcast_to(keep[:, None, :, :], (B, S, B, S)).reshape(BS, BS)
    attn_bias = jnp.where(keep > 0.5, 0.0, NEG).astype(jnp.float32)

    in_specs = [
        pl.BlockSpec((BS, D), lambda i: (0, 0)),    # x slab: whole batch, one step
        pl.BlockSpec((BS, BS), lambda i: (0, 0)),   # additive attention bias
    ] + [
        pl.BlockSpec(w.shape, lambda i: (0, 0)) for w in weights   # all weights are 2-D
    ]

    # NOTE(v7x): with 2 TensorCores one could instead keep grid=(B,) marked
    # "parallel" (one batch element per core); at these tiny sizes the fully fused
    # single step wins on every generation since per-step overhead dominates.
    out2d = pl.pallas_call(
        cm2_layer_kernel,
        out_shape=jax.ShapeDtypeStruct((BS, D), x.dtype),
        grid_spec=pltpu.PrefetchScalarGridSpec(
            num_scalar_prefetch=0,
            grid=(1,),
            in_specs=in_specs,
            out_specs=pl.BlockSpec((BS, D), lambda i: (0, 0)),
        ),
        compiler_params=pltpu.CompilerParams(dimension_semantics=("arbitrary",)),
    )(x2d, attn_bias, *weights)
    return out2d.reshape(B, S, D)


# ---- deterministic parameter init (shapes from the module's __init__) ---------
def init_params(key):
    ks = jax.random.split(key, 13)
    s = 0.05
    p = {}
    # nn.MultiheadAttention: in_proj (3D, D), out_proj (D, D) — stored pre-transposed.
    p["in_proj_wT"] = s * jax.random.normal(ks[0], (D, 3 * D), jnp.float32)
    p["in_proj_b"] = s * jax.random.normal(ks[1], (1, 3 * D), jnp.float32)
    p["out_proj_wT"] = s * jax.random.normal(ks[2], (D, D), jnp.float32)
    p["out_proj_b"] = s * jax.random.normal(ks[3], (1, D), jnp.float32)
    # LayerNorms
    p["norm1_g"] = 1.0 + 0.1 * jax.random.normal(ks[4], (1, D), jnp.float32)
    p["norm1_b"] = 0.1 * jax.random.normal(ks[5], (1, D), jnp.float32)
    p["norm2_g"] = 1.0 + 0.1 * jax.random.normal(ks[6], (1, D), jnp.float32)
    p["norm2_b"] = 0.1 * jax.random.normal(ks[7], (1, D), jnp.float32)
    # gate_linear (1, D) no bias; linear1 (DFF, D); linear2 (D, DFF) — pre-transposed.
    p["gate_wT"] = s * jax.random.normal(ks[8], (D, 1), jnp.float32)
    p["w1T"] = s * jax.random.normal(ks[9], (D, DFF), jnp.float32)
    p["b1"] = s * jax.random.normal(ks[10], (1, DFF), jnp.float32)
    p["w2T"] = s * jax.random.normal(ks[11], (DFF, D), jnp.float32)
    p["b2"] = s * jax.random.normal(ks[12], (1, D), jnp.float32)
    return p


# ---- pure-JAX reference (mirrors the PyTorch forward) --------------------------
def reference(x, mask, p):
    qkv = x @ p["in_proj_wT"] + p["in_proj_b"]                 # (B, S, 3D)
    q, k, v = jnp.split(qkv, 3, axis=-1)

    def heads(t):
        return t.reshape(B, S, H, DH).transpose(0, 2, 1, 3)    # (B, H, S, DH)

    qh, kh, vh = heads(q), heads(k), heads(v)
    s = jnp.einsum("bhqd,bhkd->bhqk", qh, kh) / math.sqrt(DH)
    keep = mask.astype(bool)[:, None, None, :]
    s = jnp.where(keep, s, -jnp.inf)
    pattn = jax.nn.softmax(s, axis=-1)
    ctx = jnp.einsum("bhqk,bhkd->bhqd", pattn, vh).transpose(0, 2, 1, 3).reshape(B, S, D)
    attn_out = ctx @ p["out_proj_wT"] + p["out_proj_b"]

    def ln(z, g, b):
        mu = z.mean(-1, keepdims=True)
        var = ((z - mu) ** 2).mean(-1, keepdims=True)
        return (z - mu) / jnp.sqrt(var + EPS) * g + b

    x1 = ln(x + attn_out, p["norm1_g"], p["norm1_b"])
    g = jax.nn.sigmoid(x1 @ p["gate_wT"])
    hid = x1 @ p["w1T"] + p["b1"]
    hid = jnp.maximum(hid * g, 0.0)
    ff = hid @ p["w2T"] + p["b2"]
    return ln(x1 + ff, p["norm2_g"], p["norm2_b"])


if __name__ == "__main__":
    key = jax.random.PRNGKey(0)
    kx, kp = jax.random.split(key)
    x = jax.random.normal(kx, (B, S, D), jnp.float32)
    # 1 = valid token, 0 = padded (module inverts this internally before MHA).
    key_padding_mask = jnp.array(
        [[1, 1, 1, 1, 1, 1, 0, 0],
         [1, 1, 1, 1, 1, 1, 1, 1]], dtype=jnp.float32)
    params = init_params(kp)

    out = cm2_transformer_layer(x, key_padding_mask, params)
    out = jax.block_until_ready(out)

    ref = reference(x, key_padding_mask, params)
    assert out.shape == (B, S, D)
    assert bool(jnp.all(jnp.isfinite(out)))
    assert bool(jnp.allclose(out, ref, atol=5e-2, rtol=5e-2)), \
        f"max abs diff {float(jnp.max(jnp.abs(out - ref)))}"

    print("KERNEL_OK")
</pallas_src>

<mosaic_0001>
module attributes {stable_mosaic.version = 11 : i64} {
  func.func @cm2_layer_kernel(%arg0: i32, %arg1: memref<16x32xf32, #tpu.memory_space<vmem>>, %arg2: memref<16x16xf32, #tpu.memory_space<vmem>>, %arg3: memref<32x96xf32, #tpu.memory_space<vmem>>, %arg4: memref<1x96xf32, #tpu.memory_space<vmem>>, %arg5: memref<32x32xf32, #tpu.memory_space<vmem>>, %arg6: memref<1x32xf32, #tpu.memory_space<vmem>>, %arg7: memref<1x32xf32, #tpu.memory_space<vmem>>, %arg8: memref<1x32xf32, #tpu.memory_space<vmem>>, %arg9: memref<1x32xf32, #tpu.memory_space<vmem>>, %arg10: memref<32x64xf32, #tpu.memory_space<vmem>>, %arg11: memref<1x64xf32, #tpu.memory_space<vmem>>, %arg12: memref<64x32xf32, #tpu.memory_space<vmem>>, %arg13: memref<1x32xf32, #tpu.memory_space<vmem>>, %arg14: memref<1x32xf32, #tpu.memory_space<vmem>>, %arg15: memref<1x32xf32, #tpu.memory_space<vmem>>, %arg16: memref<16x32xf32, #tpu.memory_space<vmem>>) attributes {dimension_semantics = [#tpu.dimension_semantics<arbitrary>], iteration_bounds = array<i64: 1>, scalar_prefetch = 0 : i64, scratch_operands = 0 : i64, tpu.core_type = #tpu.core_type<tc>, window_params = [{pipeline_mode = #tpu.pipeline_mode<synchronous>, transform_indices = @transform_0, window_bounds = array<i64: 16, 32>}, {pipeline_mode = #tpu.pipeline_mode<synchronous>, transform_indices = @transform_1, window_bounds = array<i64: 16, 16>}, {pipeline_mode = #tpu.pipeline_mode<synchronous>, transform_indices = @transform_2, window_bounds = array<i64: 32, 96>}, {pipeline_mode = #tpu.pipeline_mode<synchronous>, transform_indices = @transform_3, window_bounds = array<i64: 1, 96>}, {pipeline_mode = #tpu.pipeline_mode<synchronous>, transform_indices = @transform_4, window_bounds = array<i64: 32, 32>}, {pipeline_mode = #tpu.pipeline_mode<synchronous>, transform_indices = @transform_5, window_bounds = array<i64: 1, 32>}, {pipeline_mode = #tpu.pipeline_mode<synchronous>, transform_indices = @transform_6, window_bounds = array<i64: 1, 32>}, {pipeline_mode = #tpu.pipeline_mode<synchronous>, transform_indices = @transform_7, window_bounds = array<i64: 1, 32>}, {pipeline_mode = #tpu.pipeline_mode<synchronous>, transform_indices = @transform_8, window_bounds = array<i64: 1, 32>}, {pipeline_mode = #tpu.pipeline_mode<synchronous>, transform_indices = @transform_9, window_bounds = array<i64: 32, 64>}, {pipeline_mode = #tpu.pipeline_mode<synchronous>, transform_indices = @transform_10, window_bounds = array<i64: 1, 64>}, {pipeline_mode = #tpu.pipeline_mode<synchronous>, transform_indices = @transform_11, window_bounds = array<i64: 64, 32>}, {pipeline_mode = #tpu.pipeline_mode<synchronous>, transform_indices = @transform_12, window_bounds = array<i64: 1, 32>}, {pipeline_mode = #tpu.pipeline_mode<synchronous>, transform_indices = @transform_13, window_bounds = array<i64: 1, 32>}, {pipeline_mode = #tpu.pipeline_mode<synchronous>, transform_indices = @transform_14, window_bounds = array<i64: 1, 32>}, {pipeline_mode = #tpu.pipeline_mode<synchronous>, transform_indices = @transform_15, window_bounds = array<i64: 16, 32>}]} {
    %c0 = arith.constant 0 : index
    %c0_0 = arith.constant 0 : index
    %0 = vector.load %arg1[%c0, %c0_0] : memref<16x32xf32, #tpu.memory_space<vmem>>, vector<16x32xf32>
    %c0_1 = arith.constant 0 : index
    %c0_2 = arith.constant 0 : index
    %1 = vector.load %arg2[%c0_1, %c0_2] : memref<16x16xf32, #tpu.memory_space<vmem>>, vector<16x16xf32>
    %c0_3 = arith.constant 0 : index
    %c0_4 = arith.constant 0 : index
    %2 = vector.load %arg3[%c0_3, %c0_4] : memref<32x96xf32, #tpu.memory_space<vmem>>, vector<32x96xf32>
    %cst = arith.constant dense<0.000000e+00> : vector<16x96xf32>
    %3 = tpu.matmul %0, %2, %cst {dimension_numbers = #tpu.dot_dimension_numbers<[1], [0], [0], [1], [0, 0, 1, 1], [], []>} : vector<16x32xf32>, vector<32x96xf32>, vector<16x96xf32> -> vector<16x96xf32>
    %c0_5 = arith.constant 0 : index
    %c0_6 = arith.constant 0 : index
    %4 = vector.load %arg4[%c0_5, %c0_6] : memref<1x96xf32, #tpu.memory_space<vmem>>, vector<1x96xf32>
    %5 = vector.broadcast %4 : vector<1x96xf32> to vector<16x96xf32>
    %6 = arith.addf %3, %5 : vector<16x96xf32>
    %7 = vector.extract_strided_slice %6 {offsets = [0, 0], sizes = [16, 32], strides = [1, 1]} : vector<16x96xf32> to vector<16x32xf32>
    %cst_7 = arith.constant 0.353553385 : f32
    %8 = vector.broadcast %cst_7 : f32 to vector<16x32xf32>
    %9 = arith.mulf %7, %8 : vector<16x32xf32>
    %10 = vector.extract_strided_slice %6 {offsets = [0, 32], sizes = [16, 32], strides = [1, 1]} : vector<16x96xf32> to vector<16x32xf32>
    %11 = vector.extract_strided_slice %6 {offsets = [0, 64], sizes = [16, 32], strides = [1, 1]} : vector<16x96xf32> to vector<16x32xf32>
    %12 = vector.extract_strided_slice %9 {offsets = [0, 0], sizes = [16, 8], strides = [1, 1]} : vector<16x32xf32> to vector<16x8xf32>
    %13 = vector.extract_strided_slice %10 {offsets = [0, 0], sizes = [16, 8], strides = [1, 1]} : vector<16x32xf32> to vector<16x8xf32>
    %cst_8 = arith.constant dense<0.000000e+00> : vector<16x16xf32>
    %14 = tpu.matmul %12, %13, %cst_8 {dimension_numbers = #tpu.dot_dimension_numbers<[1], [1], [0], [0], [0, 0, 1, 0], [], []>} : vector<16x8xf32>, vector<16x8xf32>, vector<16x16xf32> -> vector<16x16xf32>
    %15 = arith.addf %14, %1 : vector<16x16xf32>
    %cst_9 = arith.constant dense<0xFF800000> : vector<16xf32>
    %16 = vector.multi_reduction <maximumf>, %15, %cst_9 [1] : vector<16x16xf32> to vector<16xf32>
    %17 = vector.shape_cast %16 : vector<16xf32> to vector<16x1xf32>
    %18 = vector.broadcast %17 : vector<16x1xf32> to vector<16x16xf32>
    %19 = arith.subf %15, %18 : vector<16x16xf32>
    %20 = math.exp %19 : vector<16x16xf32>
    %cst_10 = arith.constant dense<0.000000e+00> : vector<16xf32>
    %21 = vector.multi_reduction <add>, %20, %cst_10 [1] : vector<16x16xf32> to vector<16xf32>
    %22 = vector.shape_cast %21 : vector<16xf32> to vector<16x1xf32>
    %23 = tpu.reciprocal %22 {approx = true} : vector<16x1xf32> -> vector<16x1xf32>
    %24 = vector.broadcast %23 : vector<16x1xf32> to vector<16x16xf32>
    %25 = arith.mulf %20, %24 : vector<16x16xf32>
    %26 = vector.extract_strided_slice %11 {offsets = [0, 0], sizes = [16, 8], strides = [1, 1]} : vector<16x32xf32> to vector<16x8xf32>
    %cst_11 = arith.constant dense<0.000000e+00> : vector<16x8xf32>
    %27 = tpu.matmul %25, %26, %cst_11 {dimension_numbers = #tpu.dot_dimension_numbers<[1], [0], [0], [1], [0, 0, 1, 1], [], []>} : vector<16x16xf32>, vector<16x8xf32>, vector<16x8xf32> -> vector<16x8xf32>
    %28 = vector.extract_strided_slice %9 {offsets = [0, 8], sizes = [16, 8], strides = [1, 1]} : vector<16x32xf32> to vector<16x8xf32>
    %29 = vector.extract_strided_slice %10 {offsets = [0, 8], sizes = [16, 8], strides = [1, 1]} : vector<16x32xf32> to vector<16x8xf32>
    %cst_12 = arith.constant dense<0.000000e+00> : vector<16x16xf32>
    %30 = tpu.matmul %28, %29, %cst_12 {dimension_numbers = #tpu.dot_dimension_numbers<[1], [1], [0], [0], [0, 0, 1, 0], [], []>} : vector<16x8xf32>, vector<16x8xf32>, vector<16x16xf32> -> vector<16x16xf32>
    %31 = arith.addf %30, %1 : vector<16x16xf32>
    %cst_13 = arith.constant dense<0xFF800000> : vector<16xf32>
    %32 = vector.multi_reduction <maximumf>, %31, %cst_13 [1] : vector<16x16xf32> to vector<16xf32>
    %33 = vector.shape_cast %32 : vector<16xf32> to vector<16x1xf32>
    %34 = vector.broadcast %33 : vector<16x1xf32> to vector<16x16xf32>
    %35 = arith.subf %31, %34 : vector<16x16xf32>
    %36 = math.exp %35 : vector<16x16xf32>
    %cst_14 = arith.constant dense<0.000000e+00> : vector<16xf32>
    %37 = vector.multi_reduction <add>, %36, %cst_14 [1] : vector<16x16xf32> to vector<16xf32>
    %38 = vector.shape_cast %37 : vector<16xf32> to vector<16x1xf32>
    %39 = tpu.reciprocal %38 {approx = true} : vector<16x1xf32> -> vector<16x1xf32>
    %40 = vector.broadcast %39 : vector<16x1xf32> to vector<16x16xf32>
    %41 = arith.mulf %36, %40 : vector<16x16xf32>
    %42 = vector.extract_strided_slice %11 {offsets = [0, 8], sizes = [16, 8], strides = [1, 1]} : vector<16x32xf32> to vector<16x8xf32>
    %cst_15 = arith.constant dense<0.000000e+00> : vector<16x8xf32>
    %43 = tpu.matmul %41, %42, %cst_15 {dimension_numbers = #tpu.dot_dimension_numbers<[1], [0], [0], [1], [0, 0, 1, 1], [], []>} : vector<16x16xf32>, vector<16x8xf32>, vector<16x8xf32> -> vector<16x8xf32>
    %44 = vector.extract_strided_slice %9 {offsets = [0, 16], sizes = [16, 8], strides = [1, 1]} : vector<16x32xf32> to vector<16x8xf32>
    %45 = vector.extract_strided_slice %10 {offsets = [0, 16], sizes = [16, 8], strides = [1, 1]} : vector<16x32xf32> to vector<16x8xf32>
    %cst_16 = arith.constant dense<0.000000e+00> : vector<16x16xf32>
    %46 = tpu.matmul %44, %45, %cst_16 {dimension_numbers = #tpu.dot_dimension_numbers<[1], [1], [0], [0], [0, 0, 1, 0], [], []>} : vector<16x8xf32>, vector<16x8xf32>, vector<16x16xf32> -> vector<16x16xf32>
    %47 = arith.addf %46, %1 : vector<16x16xf32>
    %cst_17 = arith.constant dense<0xFF800000> : vector<16xf32>
    %48 = vector.multi_reduction <maximumf>, %47, %cst_17 [1] : vector<16x16xf32> to vector<16xf32>
    %49 = vector.shape_cast %48 : vector<16xf32> to vector<16x1xf32>
    %50 = vector.broadcast %49 : vector<16x1xf32> to vector<16x16xf32>
    %51 = arith.subf %47, %50 : vector<16x16xf32>
    %52 = math.exp %51 : vector<16x16xf32>
    %cst_18 = arith.constant dense<0.000000e+00> : vector<16xf32>
    %53 = vector.multi_reduction <add>, %52, %cst_18 [1] : vector<16x16xf32> to vector<16xf32>
    %54 = vector.shape_cast %53 : vector<16xf32> to vector<16x1xf32>
    %55 = tpu.reciprocal %54 {approx = true} : vector<16x1xf32> -> vector<16x1xf32>
    %56 = vector.broadcast %55 : vector<16x1xf32> to vector<16x16xf32>
    %57 = arith.mulf %52, %56 : vector<16x16xf32>
    %58 = vector.extract_strided_slice %11 {offsets = [0, 16], sizes = [16, 8], strides = [1, 1]} : vector<16x32xf32> to vector<16x8xf32>
    %cst_19 = arith.constant dense<0.000000e+00> : vector<16x8xf32>
    %59 = tpu.matmul %57, %58, %cst_19 {dimension_numbers = #tpu.dot_dimension_numbers<[1], [0], [0], [1], [0, 0, 1, 1], [], []>} : vector<16x16xf32>, vector<16x8xf32>, vector<16x8xf32> -> vector<16x8xf32>
    %60 = vector.extract_strided_slice %9 {offsets = [0, 24], sizes = [16, 8], strides = [1, 1]} : vector<16x32xf32> to vector<16x8xf32>
    %61 = vector.extract_strided_slice %10 {offsets = [0, 24], sizes = [16, 8], strides = [1, 1]} : vector<16x32xf32> to vector<16x8xf32>
    %cst_20 = arith.constant dense<0.000000e+00> : vector<16x16xf32>
    %62 = tpu.matmul %60, %61, %cst_20 {dimension_numbers = #tpu.dot_dimension_numbers<[1], [1], [0], [0], [0, 0, 1, 0], [], []>} : vector<16x8xf32>, vector<16x8xf32>, vector<16x16xf32> -> vector<16x16xf32>
    %63 = arith.addf %62, %1 : vector<16x16xf32>
    %cst_21 = arith.constant dense<0xFF800000> : vector<16xf32>
    %64 = vector.multi_reduction <maximumf>, %63, %cst_21 [1] : vector<16x16xf32> to vector<16xf32>
    %65 = vector.shape_cast %64 : vector<16xf32> to vector<16x1xf32>
    %66 = vector.broadcast %65 : vector<16x1xf32> to vector<16x16xf32>
    %67 = arith.subf %63, %66 : vector<16x16xf32>
    %68 = math.exp %67 : vector<16x16xf32>
    %cst_22 = arith.constant dense<0.000000e+00> : vector<16xf32>
    %69 = vector.multi_reduction <add>, %68, %cst_22 [1] : vector<16x16xf32> to vector<16xf32>
    %70 = vector.shape_cast %69 : vector<16xf32> to vector<16x1xf32>
    %71 = tpu.reciprocal %70 {approx = true} : vector<16x1xf32> -> vector<16x1xf32>
    %72 = vector.broadcast %71 : vector<16x1xf32> to vector<16x16xf32>
    %73 = arith.mulf %68, %72 : vector<16x16xf32>
    %74 = vector.extract_strided_slice %11 {offsets = [0, 24], sizes = [16, 8], strides = [1, 1]} : vector<16x32xf32> to vector<16x8xf32>
    %cst_23 = arith.constant dense<0.000000e+00> : vector<16x8xf32>
    %75 = tpu.matmul %73, %74, %cst_23 {dimension_numbers = #tpu.dot_dimension_numbers<[1], [0], [0], [1], [0, 0, 1, 1], [], []>} : vector<16x16xf32>, vector<16x8xf32>, vector<16x8xf32> -> vector<16x8xf32>
    %76 = tpu.concatenate %27, %43, %59, %75 in 1 : vector<16x8xf32>, vector<16x8xf32>, vector<16x8xf32>, vector<16x8xf32> -> vector<16x32xf32>
    %c0_24 = arith.constant 0 : index
    %c0_25 = arith.constant 0 : index
    %77 = vector.load %arg5[%c0_24, %c0_25] : memref<32x32xf32, #tpu.memory_space<vmem>>, vector<32x32xf32>
    %cst_26 = arith.constant dense<0.000000e+00> : vector<16x32xf32>
    %78 = tpu.matmul %76, %77, %cst_26 {dimension_numbers = #tpu.dot_dimension_numbers<[1], [0], [0], [1], [0, 0, 1, 1], [], []>} : vector<16x32xf32>, vector<32x32xf32>, vector<16x32xf32> -> vector<16x32xf32>
    %c0_27 = arith.constant 0 : index
    %c0_28 = arith.constant 0 : index
    %79 = vector.load %arg6[%c0_27, %c0_28] : memref<1x32xf32, #tpu.memory_space<vmem>>, vector<1x32xf32>
    %80 = vector.broadcast %79 : vector<1x32xf32> to vector<16x32xf32>
    %81 = arith.addf %78, %80 : vector<16x32xf32>
    %82 = arith.addf %0, %81 : vector<16x32xf32>
    %cst_29 = arith.constant dense<0.000000e+00> : vector<16xf32>
    %83 = vector.multi_reduction <add>, %82, %cst_29 [1] : vector<16x32xf32> to vector<16xf32>
    %84 = vector.shape_cast %83 : vector<16xf32> to vector<16x1xf32>
    %cst_30 = arith.constant 3.200000e+01 : f32
    %85 = vector.broadcast %cst_30 : f32 to vector<16x1xf32>
    %86 = arith.divf %84, %85 : vector<16x1xf32>
    %87 = vector.broadcast %86 : vector<16x1xf32> to vector<16x32xf32>
    %88 = arith.subf %82, %87 : vector<16x32xf32>
    %89 = arith.mulf %88, %88 : vector<16x32xf32>
    %cst_31 = arith.constant dense<0.000000e+00> : vector<16xf32>
    %90 = vector.multi_reduction <add>, %89, %cst_31 [1] : vector<16x32xf32> to vector<16xf32>
    %91 = vector.shape_cast %90 : vector<16xf32> to vector<16x1xf32>
    %cst_32 = arith.constant 3.200000e+01 : f32
    %92 = vector.broadcast %cst_32 : f32 to vector<16x1xf32>
    %93 = arith.divf %91, %92 : vector<16x1xf32>
    %94 = vector.broadcast %86 : vector<16x1xf32> to vector<16x32xf32>
    %95 = arith.subf %82, %94 : vector<16x32xf32>
    %cst_33 = arith.constant 9.99999974E-6 : f32
    %96 = vector.broadcast %cst_33 : f32 to vector<16x1xf32>
    %97 = arith.addf %93, %96 : vector<16x1xf32>
    %98 = math.rsqrt %97 : vector<16x1xf32>
    %99 = vector.broadcast %98 : vector<16x1xf32> to vector<16x32xf32>
    %100 = arith.mulf %95, %99 : vector<16x32xf32>
    %c0_34 = arith.constant 0 : index
    %c0_35 = arith.constant 0 : index
    %101 = vector.load %arg7[%c0_34, %c0_35] : memref<1x32xf32, #tpu.memory_space<vmem>>, vector<1x32xf32>
    %102 = vector.broadcast %101 : vector<1x32xf32> to vector<16x32xf32>
    %103 = arith.mulf %100, %102 : vector<16x32xf32>
    %c0_36 = arith.constant 0 : index
    %c0_37 = arith.constant 0 : index
    %104 = vector.load %arg8[%c0_36, %c0_37] : memref<1x32xf32, #tpu.memory_space<vmem>>, vector<1x32xf32>
    %105 = vector.broadcast %104 : vector<1x32xf32> to vector<16x32xf32>
    %106 = arith.addf %103, %105 : vector<16x32xf32>
    %c0_38 = arith.constant 0 : index
    %c0_39 = arith.constant 0 : index
    %107 = vector.load %arg9[%c0_38, %c0_39] : memref<1x32xf32, #tpu.memory_space<vmem>>, vector<1x32xf32>
    %108 = vector.broadcast %107 : vector<1x32xf32> to vector<16x32xf32>
    %109 = arith.mulf %106, %108 : vector<16x32xf32>
    %cst_40 = arith.constant dense<0.000000e+00> : vector<16xf32>
    %110 = vector.multi_reduction <add>, %109, %cst_40 [1] : vector<16x32xf32> to vector<16xf32>
    %111 = vector.shape_cast %110 : vector<16xf32> to vector<16x1xf32>
    %112 = arith.negf %111 : vector<16x1xf32>
    %113 = math.exp %112 : vector<16x1xf32>
    %cst_41 = arith.constant 1.000000e+00 : f32
    %114 = vector.broadcast %cst_41 : f32 to vector<16x1xf32>
    %115 = arith.addf %114, %113 : vector<16x1xf32>
    %116 = arith.divf %114, %115 : vector<16x1xf32>
    %c0_42 = arith.constant 0 : index
    %c0_43 = arith.constant 0 : index
    %117 = vector.load %arg10[%c0_42, %c0_43] : memref<32x64xf32, #tpu.memory_space<vmem>>, vector<32x64xf32>
    %cst_44 = arith.constant dense<0.000000e+00> : vector<16x64xf32>
    %118 = tpu.matmul %106, %117, %cst_44 {dimension_numbers = #tpu.dot_dimension_numbers<[1], [0], [0], [1], [0, 0, 1, 1], [], []>} : vector<16x32xf32>, vector<32x64xf32>, vector<16x64xf32> -> vector<16x64xf32>
    %c0_45 = arith.constant 0 : index
    %c0_46 = arith.constant 0 : index
    %119 = vector.load %arg11[%c0_45, %c0_46] : memref<1x64xf32, #tpu.memory_space<vmem>>, vector<1x64xf32>
    %120 = vector.broadcast %119 : vector<1x64xf32> to vector<16x64xf32>
    %121 = arith.addf %118, %120 : vector<16x64xf32>
    %122 = vector.broadcast %116 : vector<16x1xf32> to vector<16x64xf32>
    %123 = arith.mulf %121, %122 : vector<16x64xf32>
    %cst_47 = arith.constant 0.000000e+00 : f32
    %124 = vector.broadcast %cst_47 : f32 to vector<16x64xf32>
    %125 = arith.maximumf %123, %124 : vector<16x64xf32>
    %c0_48 = arith.constant 0 : index
    %c0_49 = arith.constant 0 : index
    %126 = vector.load %arg12[%c0_48, %c0_49] : memref<64x32xf32, #tpu.memory_space<vmem>>, vector<64x32xf32>
    %cst_50 = arith.constant dense<0.000000e+00> : vector<16x32xf32>
    %127 = tpu.matmul %125, %126, %cst_50 {dimension_numbers = #tpu.dot_dimension_numbers<[1], [0], [0], [1], [0, 0, 1, 1], [], []>} : vector<16x64xf32>, vector<64x32xf32>, vector<16x32xf32> -> vector<16x32xf32>
    %c0_51 = arith.constant 0 : index
    %c0_52 = arith.constant 0 : index
    %128 = vector.load %arg13[%c0_51, %c0_52] : memref<1x32xf32, #tpu.memory_space<vmem>>, vector<1x32xf32>
    %129 = vector.broadcast %128 : vector<1x32xf32> to vector<16x32xf32>
    %130 = arith.addf %127, %129 : vector<16x32xf32>
    %131 = arith.addf %106, %130 : vector<16x32xf32>
    %cst_53 = arith.constant dense<0.000000e+00> : vector<16xf32>
    %132 = vector.multi_reduction <add>, %131, %cst_53 [1] : vector<16x32xf32> to vector<16xf32>
    %133 = vector.shape_cast %132 : vector<16xf32> to vector<16x1xf32>
    %cst_54 = arith.constant 3.200000e+01 : f32
    %134 = vector.broadcast %cst_54 : f32 to vector<16x1xf32>
    %135 = arith.divf %133, %134 : vector<16x1xf32>
    %136 = vector.broadcast %135 : vector<16x1xf32> to vector<16x32xf32>
    %137 = arith.subf %131, %136 : vector<16x32xf32>
    %138 = arith.mulf %137, %137 : vector<16x32xf32>
    %cst_55 = arith.constant dense<0.000000e+00> : vector<16xf32>
    %139 = vector.multi_reduction <add>, %138, %cst_55 [1] : vector<16x32xf32> to vector<16xf32>
    %140 = vector.shape_cast %139 : vector<16xf32> to vector<16x1xf32>
    %cst_56 = arith.constant 3.200000e+01 : f32
    %141 = vector.broadcast %cst_56 : f32 to vector<16x1xf32>
    %142 = arith.divf %140, %141 : vector<16x1xf32>
    %143 = vector.broadcast %135 : vector<16x1xf32> to vector<16x32xf32>
    %144 = arith.subf %131, %143 : vector<16x32xf32>
    %cst_57 = arith.constant 9.99999974E-6 : f32
    %145 = vector.broadcast %cst_57 : f32 to vector<16x1xf32>
    %146 = arith.addf %142, %145 : vector<16x1xf32>
    %147 = math.rsqrt %146 : vector<16x1xf32>
    %148 = vector.broadcast %147 : vector<16x1xf32> to vector<16x32xf32>
    %149 = arith.mulf %144, %148 : vector<16x32xf32>
    %c0_58 = arith.constant 0 : index
    %c0_59 = arith.constant 0 : index
    %150 = vector.load %arg14[%c0_58, %c0_59] : memref<1x32xf32, #tpu.memory_space<vmem>>, vector<1x32xf32>
    %151 = vector.broadcast %150 : vector<1x32xf32> to vector<16x32xf32>
    %152 = arith.mulf %149, %151 : vector<16x32xf32>
    %c0_60 = arith.constant 0 : index
    %c0_61 = arith.constant 0 : index
    %153 = vector.load %arg15[%c0_60, %c0_61] : memref<1x32xf32, #tpu.memory_space<vmem>>, vector<1x32xf32>
    %154 = vector.broadcast %153 : vector<1x32xf32> to vector<16x32xf32>
    %155 = arith.addf %152, %154 : vector<16x32xf32>
    %c0_62 = arith.constant 0 : index
    %c0_63 = arith.constant 0 : index
    %156 = vector.load %arg16[%c0_62, %c0_63] : memref<16x32xf32, #tpu.memory_space<vmem>>, vector<16x32xf32>
    tpu.vector_store %arg16[%c0_62, %c0_63], %155 {strides = array<i32>} : memref<16x32xf32, #tpu.memory_space<vmem>>, vector<16x32xf32>,
    return
  }
  func.func @transform_0(%arg0: i32) -> (i32, i32) {
    %c0_i32 = arith.constant 0 : i32
    %c0_i32_0 = arith.constant 0 : i32
    %c0_i32_1 = arith.constant 0 : i32
    return %c0_i32, %c0_i32_0 : i32, i32
  }
  func.func @transform_1(%arg0: i32) -> (i32, i32) {
    %c0_i32 = arith.constant 0 : i32
    %c0_i32_0 = arith.constant 0 : i32
    %c0_i32_1 = arith.constant 0 : i32
    return %c0_i32, %c0_i32_0 : i32, i32
  }
  func.func @transform_2(%arg0: i32) -> (i32, i32) {
    %c0_i32 = arith.constant 0 : i32
    %c0_i32_0 = arith.constant 0 : i32
    %c0_i32_1 = arith.constant 0 : i32
    return %c0_i32, %c0_i32_0 : i32, i32
  }
  func.func @transform_3(%arg0: i32) -> (i32, i32) {
    %c0_i32 = arith.constant 0 : i32
    %c0_i32_0 = arith.constant 0 : i32
    %c0_i32_1 = arith.constant 0 : i32
    return %c0_i32, %c0_i32_0 : i32, i32
  }
  func.func @transform_4(%arg0: i32) -> (i32, i32) {
    %c0_i32 = arith.constant 0 : i32
    %c0_i32_0 = arith.constant 0 : i32
    %c0_i32_1 = arith.constant 0 : i32
    return %c0_i32, %c0_i32_0 : i32, i32
  }
  func.func @transform_5(%arg0: i32) -> (i32, i32) {
    %c0_i32 = arith.constant 0 : i32
    %c0_i32_0 = arith.constant 0 : i32
    %c0_i32_1 = arith.constant 0 : i32
    return %c0_i32, %c0_i32_0 : i32, i32
  }
  func.func @transform_6(%arg0: i32) -> (i32, i32) {
    %c0_i32 = arith.constant 0 : i32
    %c0_i32_0 = arith.constant 0 : i32
    %c0_i32_1 = arith.constant 0 : i32
    return %c0_i32, %c0_i32_0 : i32, i32
  }
  func.func @transform_7(%arg0: i32) -> (i32, i32) {
    %c0_i32 = arith.constant 0 : i32
    %c0_i32_0 = arith.constant 0 : i32
    %c0_i32_1 = arith.constant 0 : i32
    return %c0_i32, %c0_i32_0 : i32, i32
  }
  func.func @transform_8(%arg0: i32) -> (i32, i32) {
    %c0_i32 = arith.constant 0 : i32
    %c0_i32_0 = arith.constant 0 : i32
    %c0_i32_1 = arith.constant 0 : i32
    return %c0_i32, %c0_i32_0 : i32, i32
  }
  func.func @transform_9(%arg0: i32) -> (i32, i32) {
    %c0_i32 = arith.constant 0 : i32
    %c0_i32_0 = arith.constant 0 : i32
    %c0_i32_1 = arith.constant 0 : i32
    return %c0_i32, %c0_i32_0 : i32, i32
  }
  func.func @transform_10(%arg0: i32) -> (i32, i32) {
    %c0_i32 = arith.constant 0 : i32
    %c0_i32_0 = arith.constant 0 : i32
    %c0_i32_1 = arith.constant 0 : i32
    return %c0_i32, %c0_i32_0 : i32, i32
  }
  func.func @transform_11(%arg0: i32) -> (i32, i32) {
    %c0_i32 = arith.constant 0 : i32
    %c0_i32_0 = arith.constant 0 : i32
    %c0_i32_1 = arith.constant 0 : i32
    return %c0_i32, %c0_i32_0 : i32, i32
  }
  func.func @transform_12(%arg0: i32) -> (i32, i32) {
    %c0_i32 = arith.constant 0 : i32
    %c0_i32_0 = arith.constant 0 : i32
    %c0_i32_1 = arith.constant 0 : i32
    return %c0_i32, %c0_i32_0 : i32, i32
  }
  func.func @transform_13(%arg0: i32) -> (i32, i32) {
    %c0_i32 = arith.constant 0 : i32
    %c0_i32_0 = arith.constant 0 : i32
    %c0_i32_1 = arith.constant 0 : i32
    return %c0_i32, %c0_i32_0 : i32, i32
  }
  func.func @transform_14(%arg0: i32) -> (i32, i32) {
    %c0_i32 = arith.constant 0 : i32
    %c0_i32_0 = arith.constant 0 : i32
    %c0_i32_1 = arith.constant 0 : i32
    return %c0_i32, %c0_i32_0 : i32, i32
  }
  func.func @transform_15(%arg0: i32) -> (i32, i32) {
    %c0_i32 = arith.constant 0 : i32
    %c0_i32_0 = arith.constant 0 : i32
    %c0_i32_1 = arith.constant 0 : i32
    return %c0_i32, %c0_i32_0 : i32, i32
  }
}

</mosaic_0001>

<bundles_post_ra>
// kernel: tpu_custom_call.1
= control target key start
LH: loop header
LB: loop body
LE: loop exit
PB: predicated region body
PF: predicated region fallthrough
CT: control target
= control target key end

     0   :  { %20 = vsyncpa [#allocation3], 0  ;;  %s2125_s0 = inlined_call_operand.hbm [shape: f32[16,32], index: 0, kind: input, shape index: {}]   ;;  %s2126_s1 = inlined_call_operand.hbm [shape: f32[16,16], index: 1, kind: input, shape index: {}]   ;;  %s2127_s2 = inlined_call_operand.vmem [shape: f32[32,96], index: 2, kind: input, shape index: {}]   ;;  %s2128_s3 = inlined_call_operand.vmem [shape: f32[1,96], index: 3, kind: input, shape index: {}]   ;;  %s2129_s4 = inlined_call_operand.vmem [shape: f32[32,32], index: 4, kind: input, shape index: {}]   ;;  %s2130_s5 = inlined_call_operand.vmem [shape: f32[1,32], index: 5, kind: input, shape index: {}]   ;;  %s2131_s6 = inlined_call_operand.vmem [shape: f32[1,32], index: 6, kind: input, shape index: {}]   ;;  %s2132_s7 = inlined_call_operand.vmem [shape: f32[1,32], index: 7, kind: input, shape index: {}]   ;;  %s2133_s8 = inlined_call_operand.vmem [shape: f32[1,32], index: 8, kind: input, shape index: {}]   ;;  %s2134_s9 = inlined_call_operand.vmem [shape: f32[32,64], index: 9, kind: input, shape index: {}]   ;;  %s2135_s10 = inlined_call_operand.vmem [shape: f32[1,64], index: 10, kind: input, shape index: {}]   ;;  %s2136_s11 = inlined_call_operand.vmem [shape: f32[64,32], index: 11, kind: input, shape index: {}]   ;;  %s2137_s12 = inlined_call_operand.vmem [shape: f32[1,32], index: 12, kind: input, shape index: {}]   ;;  %s2138_s13 = inlined_call_operand.vmem [shape: f32[1,32], index: 13, kind: input, shape index: {}]   ;;  %s2139_s14 = inlined_call_operand.vmem [shape: f32[1,32], index: 14, kind: input, shape index: {}]   ;;  %s2140_s15 = inlined_call_operand.hbm [shape: f32[16,32], index: 15, kind: output, shape index: {}]  }
   0x1   :  { %21 = vsyncpa [#allocation6], 0 }
   0x2   :  { %22 = vsyncpa [#allocation4], 0  ;;  %s1779_s18 = smov [#allocation2]  }
   0x3   :  { %s28_s19 = sshll.u32 %s1779_s18, 4  ;;  %s29_s19 = int_to_ptr.vmem [resolvable:$true] %s28_s19 }
   0x4   :  { %s1721_s20 = scalar_lea.vmem %s29_s19, 256  ;;  %p1726_p1 = scmp.lt.s32.totalorder %s29_s19, %s29_s19 }
   0x5   :  { %p1722_p0 = scmp.ne.s32.totalorder %s29_s19, %s1721_s20  ;;  %p1727_p2 = scmp.lt.s32.totalorder %s1721_s20, %s1721_s20 }
   0x7   :  { %p1728_p3 = por %p1727_p2, %p1726_p1 }
   0x9   :  { %p1729_p4 = pnand %p1728_p3, %p1722_p0 }
   0xb   :  { %1732 = shalt.err (!%p1729_p4)
}
   0xc   :  { %s1780_s21 = smov 128   ;;  %s1781_s22 = smov 8  }
   0xd   :  { %34 = dma.hbm_to_vmem [thread:$0]  %s2125_s0, 256, %s29_s19, [#allocation3], %s1780_s21, %s1780_s21, %s1781_s22  }
   0xe   :  { %s1782_s25 = smov [#allocation5]  }
   0xf   :  { %s40_s26 = sshll.u32 %s1782_s25, 4  ;;  %s41_s26 = int_to_ptr.vmem [resolvable:$true] %s40_s26 }
  0x10   :  { %s1741_s27 = scalar_lea.vmem %s41_s26, 256  ;;  %p1746_p6 = scmp.lt.s32.totalorder %s41_s26, %s41_s26 }
  0x11   :  { %p1742_p5 = scmp.ne.s32.totalorder %s41_s26, %s1741_s27  ;;  %p1747_p7 = scmp.lt.s32.totalorder %s1741_s27, %s1741_s27 }
  0x13   :  { %p1748_p8 = por %p1747_p7, %p1746_p6 }
  0x15   :  { %p1749_p9 = pnand %p1748_p8, %p1742_p5 }
  0x17   :  { %1752 = shalt.err (!%p1749_p9)
}
  0x18   :  { %46 = dma.hbm_to_vmem [thread:$0]  %s2126_s1, 256, %s41_s26, [#allocation6], %s1780_s21, %s1780_s21, %s1781_s22  }
  0x19   :  { %1773 = dma.done.wait [#allocation3], 256  }
  0x1a   :  { %1774 = vsyncadd [#allocation3], 4294967040 }
  0x1b   :  { %1775 = dma.done.wait [#allocation6], 256  }
  0x1c   :  { %1776 = vsyncadd [#allocation6], 4294967040  ;;  %vm94_vm0 = vcmask 261120   ;;  %v86_v0 = vld [vmem:[%s2127_s2 + $0x18] sm:$0xff]  ;;  %v85_v1 = vld [vmem:[%s2127_s2 + $0x10] sm:$0xff]  ;;  %s1784_s25 = smov 96  }
  0x1d   :  { %1539 = vmatprep.subr.mxu1 %v86_v0  ;;  %v1895_v2 = vld [vmem:[#allocation2] sm:$0xff]  ;;  %v84_v3 = vld [vmem:[%s2127_s2 + $0x8] sm:$0xff]  ;;  %vm184_vm1 = vcmask 64512   ;;  %v1942_v19 = vld [vmem:[#allocation5 + $0x8] sm:$0xff]  ;;  %vm270_vm2 = vcmask 130048   ;;  %s1786_s26 = smov 64  }
  0x1e   :  { %1540 = vmatpush3.msra.mxu1 %v86_v0  ;;  %1547 = vmatprep.mubr.msk.f32.mxu1 %vm94_vm0, %v1895_v2  ;;  %v83_v4 = vld [vmem:[%s2127_s2] sm:$0xff]  ;;  %v1905_v5 = vld [vmem:[#allocation2 + $0x8] sm:$0xff]  ;;  %s1783_s2 = smov 88   ;;  %v1944_v21 = vld [vmem:[#allocation5] sm:$0xff]  ;;  %s1787_s27 = smov 56   ;;  %vm1008_vm3 = vcmask 195584  }
  0x1f   :  { %1541 = vmatprep.subr.mxu1 %v85_v1  ;;  %v1436_v6 = vld [vmem:[%s2128_s3] ss:$0 sm:$0xff]  ;;  %s1785_s3 = smov 120   ;;  %s1788_s28 = smov 80   ;;  %vm1288_vm4 = vcmask 523264  }
  0x20   :  { %1542 = vmatpush3.msra.mxu1 %v85_v1  ;;  %s1789_s29 = smov 112   ;;  %s1790_s0 = smov 48  }
  0x21   :  { %1543 = vmatprep.subr.mxu1 %v84_v3  ;;  %s1791_s30 = smov 72   ;;  %s1792_s16 = smov 104  }
  0x22   :  { %1544 = vmatpush3.msra.mxu1 %v84_v3  ;;  %s1793_s17 = smov 40   ;;  %s1794_s18 = smov 16  }
  0x23   :  { %1545 = vmatprep.subr.mxu1 %v83_v4 }
  0x24   :  { %1546 = vmatpush3.msra.mxu1 %v83_v4 }
  0x25   :  { %1548 = vmatmul.mubr.msk.f32.vlgmr.msra.gmra.mxu1 %vm94_vm0, %v1905_v5 }
  0xe5   :  { %v1549_v7 = vpop.f32.mrf.mxu1 }
  0xe6   :  { %v1912_v8 = vadd.f32 %v1549_v7, %v1436_v6 }
  0xe7   :  { %v167_v9 = vpop.f32.mrf.mxu1 }
  0xe8   :  { %v1914_v10 = vadd.f32 %v1436_v6, %v167_v9  ;;  %386 = vrot.lane.b32.xlu1 %v1912_v8, %s1783_s2  ;;  %182 = vrot.lane.b32.xlu0 %v1912_v8, %s1784_s25  ;;  %v1926_v12 = vmul.f32 0.35355338, %v1912_v8 }
  0xea   :  { %v1919_v11 = vmul.f32 0.35355338, %v1914_v10 }
  0xec   :  { %384 = vrot.lane.b32.xlu1 %v1914_v10, %s1783_s2  ;;  %180 = vrot.lane.b32.xlu0 %v1914_v10, %s1784_s25 }
  0xed   :  { %1554 = vmatprep.mubr.msk.f32.mxu1 %vm184_vm1, %v1919_v11 }
  0xf0   :  { %382 = vrot.lane.b32.xlu1 %v1926_v12, %s1785_s3  ;;  %380 = vrot.lane.b32.xlu0 %v1919_v11, %s1785_s3 }
 0x15a   :  { %v183_v13 = vpop.permute.xlu0 %182  ;;  %v387_v14 = vpop.permute.xlu1 %386 }
 0x15b   :  { %1550 = vmatprep.subr.msk.mxu1 %vm184_vm1, %v183_v13 }
 0x15c   :  { %1551 = vmatpush3.xpose.msk.msra.mxu1 %vm184_vm1, %v183_v13 }
 0x15e   :  { %v181_v15 = vpop.permute.xlu0 %180  ;;  %v385_v17 = vpop.permute.xlu1 %384 }
 0x15f   :  { %1552 = vmatprep.subr.msk.mxu1 %vm184_vm1, %v181_v15 }
 0x160   :  { %1553 = vmatpush3.xpose.msk.msra.mxu1 %vm184_vm1, %v181_v15 }
 0x161   :  { %1564 = vmatprep.subr.msk.mxu1 %vm184_vm1, %v387_v14 }
 0x162   :  { %v381_v16 = vpop.permute.xlu0 %380  ;;  %v383_v18 = vpop.permute.xlu1 %382 }
 0x163   :  { %1555 = vmatmul.mubr.msk.f32.vlgmr.msra.gmra.mxu1 %vm184_vm1, %v1926_v12 }
 0x164   :  { %1565 = vmatpush3.xpose.msk.msra.mxu1 %vm184_vm1, %v387_v14  ;;  %1568 = vmatprep.mubr.msk.f32.mxu1 %vm184_vm1, %v381_v16 }
 0x165   :  { %1566 = vmatprep.subr.msk.mxu1 %vm184_vm1, %v385_v17 }
 0x168   :  { %1567 = vmatpush3.xpose.msk.msra.mxu1 %vm184_vm1, %v385_v17 }
 0x16b   :  { %1569 = vmatmul.mubr.msk.f32.vlgmr.msra.gmra.mxu1 %vm184_vm1, %v383_v18 }
 0x223   :  { %v1556_v20 = vpop.f32.mrf.mxu1 }
 0x224   :  { %v267_v22 = vadd.f32 %v1556_v20, %v1942_v19 }
 0x225   :  { %v261_v23 = vpop.f32.mrf.mxu1 }
 0x226   :  { %v262_v24 = vadd.f32 %v261_v23, %v1944_v21  ;;  %v274_v25 = vsel %vm270_vm2, %v267_v22, -inf }
 0x227   :  { %275 = vmax.xlane.f32.xlu1 %v274_v25 }
 0x228   :  { %v271_v26 = vsel %vm270_vm2, %v262_v24, -inf }
 0x229   :  { %272 = vmax.xlane.f32.xlu0 %v271_v26 }
 0x22b   :  { %v1570_v27 = vpop.f32.mrf.mxu1 }
 0x22c   :  { %v468_v30 = vadd.f32 %v1570_v27, %v1942_v19 }
 0x22d   :  { %v462_v28 = vpop.f32.mrf.mxu1 }
 0x22e   :  { %v463_v29 = vadd.f32 %v462_v28, %v1944_v21  ;;  %v474_v32 = vsel %vm270_vm2, %v468_v30, -inf }
 0x230   :  { %v471_v31 = vsel %vm270_vm2, %v463_v29, -inf }
 0x231   :  { %472 = vmax.xlane.f32.xlu0 %v471_v31 }
 0x235   :  { %475 = vmax.xlane.f32.xlu0 %v474_v32 }
 0x238   :  { %295 = vrot.lane.b32.xlu1 %v1912_v8, %s1786_s26 }
 0x23c   :  { %495 = vrot.lane.b32.xlu1 %v1912_v8, %s1787_s27 }
 0x240   :  { %493 = vrot.lane.b32.xlu1 %v1914_v10, %s1787_s27 }
 0x24b   :  { %293 = vrot.lane.b32.xlu0 %v1914_v10, %s1786_s26  ;;  %s1795_s26 = smov 24  }
 0x2b0   :  { %v276_v33 = vpop.xlane.xlu1 %275 }
 0x2b1   :  { %v278_v34 = vsub.f32 %v267_v22, %v276_v33 }
 0x2b2   :  { %v273_v35 = vpop.xlane.xlu0 %272 }
 0x2b3   :  { %v281_v36 = vmul.f32 1.442695, %v278_v34  ;;  %v277_v37 = vsub.f32 %v262_v24, %v273_v35 }
 0x2b4   :  { %v296_v38 = vpop.permute.xlu1 %295 }
 0x2b5   :  { %1665 = vpow2.f32 %v281_v36  ;;  %v279_v39 = vmul.f32 1.442695, %v277_v37  ;;  %1557 = vmatprep.subr.mxu0 %v296_v38 }
 0x2b6   :  { %1558 = vmatpush3.msra.mxu0 %v296_v38 }
 0x2b7   :  { %1667 = vpow2.f32 %v279_v39 }
 0x2b8   :  { %v496_v48 = vpop.permute.xlu1 %495 }
 0x2ba   :  { %v473_v40 = vpop.xlane.xlu0 %472 }
 0x2bb   :  { %v477_v52 = vsub.f32 %v463_v29, %v473_v40 }
 0x2bc   :  { %v494_v56 = vpop.permute.xlu1 %493 }
 0x2bd   :  { %v479_v53 = vmul.f32 1.442695, %v477_v52 }
 0x2be   :  { %v476_v41 = vpop.xlane.xlu0 %475 }
 0x2bf   :  { %v478_v42 = vsub.f32 %v468_v30, %v476_v41 }
 0x2c1   :  { %v481_v43 = vmul.f32 1.442695, %v478_v42 }
 0x2c2   :  { %v1666_v44 = vpop.eup %1665  ;;  %v294_v45 = vpop.permute.xlu0 %293 }
 0x2c3   :  { %1669 = vpow2.f32 %v481_v43  ;;  %1559 = vmatprep.subr.mxu0 %v294_v45  ;;  %v286_v46 = vsel %vm270_vm2, %v1666_v44, 0.0 }
 0x2c4   :  { %v1668_v47 = vpop.eup %1667  ;;  %287 = vadd.xlane.f32.xlu0 %v286_v46  ;;  %1560 = vmatpush3.msra.mxu0 %v294_v45  ;;  %1671 = vpow2.f32 %v479_v53 }
 0x2c5   :  { %1571 = vmatprep.subr.mxu0 %v496_v48  ;;  %v283_v49 = vsel %vm270_vm2, %v1668_v47, 0.0 }
 0x2c6   :  { %284 = vadd.xlane.f32.xlu1 %v283_v49 }
 0x2d0   :  { %v1670_v50 = vpop.eup %1669 }
 0x2d1   :  { %v486_v51 = vsel %vm270_vm2, %v1670_v50, 0.0  ;;  %v1672_v54 = vpop.eup %1671 }
 0x2d2   :  { %487 = vadd.xlane.f32.xlu0 %v486_v51  ;;  %v483_v55 = vsel %vm270_vm2, %v1672_v54, 0.0 }
 0x2d7   :  { %584 = vrot.lane.b32.xlu1 %v1914_v10, %s1788_s28 }
 0x2e8   :  { %586 = vrot.lane.b32.xlu0 %v1912_v8, %s1788_s28 }
 0x2ec   :  { %580 = vrot.lane.b32.xlu0 %v1919_v11, %s1789_s29 }
 0x2fb   :  { %484 = vadd.xlane.f32.xlu1 %v483_v55 }
 0x30c   :  { %582 = vrot.lane.b32.xlu1 %v1926_v12, %s1789_s29 }
 0x34d   :  { %v288_v57 = vpop.xlane.xlu0 %287 }
 0x34e   :  { %1673 = vrcp.f32 %v288_v57 }
 0x34f   :  { %v285_v58 = vpop.xlane.xlu1 %284 }
 0x350   :  { %1675 = vrcp.f32 %v285_v58 }
 0x353   :  { %v585_v1 = vpop.permute.xlu1 %584 }
 0x35b   :  { %v1674_v59 = vpop.eup %1673  ;;  %v488_v61 = vpop.xlane.xlu0 %487 }
 0x35c   :  { %v292_v63 = vmul.f32 %v1674_v59, %v1666_v44  ;;  %1677 = vrcp.f32 %v488_v61 }
 0x35d   :  { %v1676_v60 = vpop.eup %1675 }
 0x35e   :  { %v291_v62 = vmul.f32 %v1676_v60, %v1668_v47 }
 0x35f   :  { %v587_v0 = vpop.permute.xlu0 %586 }
 0x360   :  { %1561 = vmatprep.mubr.msk.f32.mxu0 %vm270_vm2, %v291_v62 }
 0x361   :  { %1562 = vmatmul.mubr.msk.f32.vlgmr.msra.gmra.mxu0 %vm270_vm2, %v292_v63 }
 0x362   :  { %1572 = vmatpush3.msra.mxu0 %v496_v48 }
 0x363   :  { %1573 = vmatprep.subr.mxu0 %v494_v56  ;;  %v581_v13 = vpop.permute.xlu0 %580 }
 0x364   :  { %1574 = vmatpush3.msra.mxu0 %v494_v56 }
 0x365   :  { %1578 = vmatprep.subr.msk.mxu0 %vm184_vm1, %v587_v0 }
 0x369   :  { %v1678_v4 = vpop.eup %1677 }
 0x36a   :  { %v492_v9 = vmul.f32 %v1678_v4, %v1670_v50 }
 0x384   :  { %v485_v3 = vpop.xlane.xlu1 %484 }
 0x385   :  { %1679 = vrcp.f32 %v485_v3 }
 0x388   :  { %v583_v14 = vpop.permute.xlu1 %582 }
 0x392   :  { %v1680_v6 = vpop.eup %1679 }
 0x393   :  { %v491_v7 = vmul.f32 %v1680_v6, %v1672_v54 }
 0x395   :  { %1575 = vmatprep.mubr.msk.f32.mxu0 %vm270_vm2, %v491_v7 }
 0x396   :  { %1576 = vmatmul.mubr.msk.f32.vlgmr.msra.gmra.mxu0 %vm270_vm2, %v492_v9  ;;  %v1013_v9 = vld [vmem:[%s2129_s4 + $0x10] sm:$0xff] }
 0x397   :  { %1579 = vmatpush3.xpose.msk.msra.mxu0 %vm184_vm1, %v587_v0  ;;  %1582 = vmatprep.mubr.msk.f32.mxu0 %vm184_vm1, %v581_v13  ;;  %v1012_v13 = vld [vmem:[%s2129_s4 + $0x8] sm:$0xff] }
 0x398   :  { %1580 = vmatprep.subr.msk.mxu0 %vm184_vm1, %v585_v1 }
 0x39b   :  { %1581 = vmatpush3.xpose.msk.msra.mxu0 %vm184_vm1, %v585_v1 }
 0x39e   :  { %1583 = vmatmul.mubr.msk.f32.vlgmr.msra.gmra.mxu0 %vm184_vm1, %v583_v14  ;;  %v1011_v14 = vld [vmem:[%s2129_s4] sm:$0xff] }
 0x421   :  { %v1976_v15 = vpop.f32.mrf.mxu0 }
 0x423   :  { %v1978_v16 = vpop.f32.mrf.mxu0 }
 0x456   :  { %v1980_v17 = vpop.f32.mrf.mxu0 }
 0x458   :  { %v1982_v18 = vpop.f32.mrf.mxu0 }
 0x45e   :  { %v1584_v20 = vpop.f32.mrf.mxu0 }
 0x45f   :  { %v668_v22 = vadd.f32 %v1584_v20, %v1942_v19 }
 0x460   :  { %v662_v23 = vpop.f32.mrf.mxu0 }
 0x461   :  { %v663_v24 = vadd.f32 %v662_v23, %v1944_v21  ;;  %v674_v25 = vsel %vm270_vm2, %v668_v22, -inf }
 0x462   :  { %675 = vmax.xlane.f32.xlu1 %v674_v25 }
 0x463   :  { %v671_v26 = vsel %vm270_vm2, %v663_v24, -inf }
 0x464   :  { %672 = vmax.xlane.f32.xlu0 %v671_v26 }
 0x473   :  { %695 = vrot.lane.b32.xlu1 %v1912_v8, %s1790_s0 }
 0x477   :  { %786 = vrot.lane.b32.xlu1 %v1912_v8, %s1791_s30 }
 0x47b   :  { %784 = vrot.lane.b32.xlu1 %v1914_v10, %s1791_s30 }
 0x47f   :  { %782 = vrot.lane.b32.xlu1 %v1926_v12, %s1792_s16 }
 0x4eb   :  { %v676_v27 = vpop.xlane.xlu1 %675 }
 0x4ec   :  { %v678_v28 = vsub.f32 %v668_v22, %v676_v27 }
 0x4ed   :  { %v673_v29 = vpop.xlane.xlu0 %672 }
 0x4ee   :  { %v681_v30 = vmul.f32 1.442695, %v678_v28  ;;  %v677_v31 = vsub.f32 %v663_v24, %v673_v29 }
 0x4ef   :  { %v696_v32 = vpop.permute.xlu1 %695 }
 0x4f0   :  { %1681 = vpow2.f32 %v681_v30  ;;  %v679_v33 = vmul.f32 1.442695, %v677_v31  ;;  %1585 = vmatprep.subr.mxu1 %v696_v32 }
 0x4f1   :  { %1586 = vmatpush3.msra.mxu1 %v696_v32 }
 0x4f2   :  { %1683 = vpow2.f32 %v679_v33 }
 0x4f3   :  { %v787_v40 = vpop.permute.xlu1 %786 }
 0x4fd   :  { %v1682_v34 = vpop.eup %1681 }
 0x4fe   :  { %v686_v35 = vsel %vm270_vm2, %v1682_v34, 0.0 }
 0x4ff   :  { %v1684_v36 = vpop.eup %1683  ;;  %687 = vadd.xlane.f32.xlu0 %v686_v35 }
 0x500   :  { %v683_v37 = vsel %vm270_vm2, %v1684_v36, 0.0 }
 0x503   :  { %684 = vadd.xlane.f32.xlu0 %v683_v37 }
 0x519   :  { %693 = vrot.lane.b32.xlu0 %v1914_v10, %s1790_s0 }
 0x51d   :  { %780 = vrot.lane.b32.xlu0 %v1919_v11, %s1792_s16  ;;  %v785_v11 = vpop.permute.xlu1 %784 }
 0x521   :  { %v783_v46 = vpop.permute.xlu1 %782 }
 0x588   :  { %v688_v12 = vpop.xlane.xlu0 %687 }
 0x589   :  { %1685 = vrcp.f32 %v688_v12 }
 0x58c   :  { %v685_v38 = vpop.xlane.xlu0 %684 }
 0x58d   :  { %1687 = vrcp.f32 %v685_v38 }
 0x590   :  { %v694_v39 = vpop.permute.xlu0 %693 }
 0x591   :  { %1587 = vmatprep.subr.mxu1 %v694_v39 }
 0x592   :  { %1588 = vmatpush3.msra.mxu1 %v694_v39 }
 0x593   :  { %1592 = vmatprep.subr.msk.mxu1 %vm184_vm1, %v787_v40 }
 0x594   :  { %v781_v45 = vpop.permute.xlu0 %780 }
 0x596   :  { %v1686_v41 = vpop.eup %1685 }
 0x597   :  { %v692_v44 = vmul.f32 %v1686_v41, %v1682_v34 }
 0x59a   :  { %v1688_v42 = vpop.eup %1687 }
 0x59b   :  { %v691_v43 = vmul.f32 %v1688_v42, %v1684_v36 }
 0x59d   :  { %1589 = vmatprep.mubr.msk.f32.mxu1 %vm270_vm2, %v691_v43 }
 0x59e   :  { %1590 = vmatmul.mubr.msk.f32.vlgmr.msra.gmra.mxu1 %vm270_vm2, %v692_v44 }
 0x59f   :  { %1593 = vmatpush3.xpose.msk.msra.mxu1 %vm184_vm1, %v787_v40  ;;  %1596 = vmatprep.mubr.msk.f32.mxu1 %vm184_vm1, %v781_v45 }
 0x5a0   :  { %1594 = vmatprep.subr.msk.mxu1 %vm184_vm1, %v785_v11 }
 0x5a3   :  { %1595 = vmatpush3.xpose.msk.msra.mxu1 %vm184_vm1, %v785_v11 }
 0x5a6   :  { %1597 = vmatmul.mubr.msk.f32.vlgmr.msra.gmra.mxu1 %vm184_vm1, %v783_v46 }
 0x65e   :  { %v1591_v47 = vpop.f32.mrf.mxu1 }
 0x660   :  { %v771_v48 = vpop.f32.mrf.mxu1 }
 0x666   :  { %v1598_v49 = vpop.f32.mrf.mxu1 }
 0x667   :  { %v868_v50 = vadd.f32 %v1598_v49, %v1942_v19  ;;  %v1177_v49 = vld [vmem:[%s2134_s9] sm:$0xff] }
 0x668   :  { %v862_v51 = vpop.f32.mrf.mxu1 }
 0x669   :  { %v863_v52 = vadd.f32 %v862_v51, %v1944_v21  ;;  %v874_v53 = vsel %vm270_vm2, %v868_v50, -inf }
 0x66a   :  { %875 = vmax.xlane.f32.xlu1 %v874_v53 }
 0x66b   :  { %v871_v54 = vsel %vm270_vm2, %v863_v52, -inf }
 0x66c   :  { %872 = vmax.xlane.f32.xlu0 %v871_v54 }
 0x67b   :  { %895 = vrot.lane.b32.xlu1 %v1912_v8, %s1793_s17 }
 0x67f   :  { %982 = vrot.lane.b32.xlu1 %v1982_v18, %s1781_s22 }
 0x683   :  { %984 = vrot.lane.b32.xlu1 %v1980_v17, %s1781_s22 }
 0x687   :  { %992 = vrot.lane.b32.xlu1 %v1591_v47, %s1794_s18  ;;  %v1179_v47 = vld [vmem:[%s2134_s9 + $0x10] sm:$0xff] }
 0x6f3   :  { %v876_v19 = vpop.xlane.xlu1 %875 }
 0x6f4   :  { %v878_v55 = vsub.f32 %v868_v50, %v876_v19 }
 0x6f5   :  { %v873_v21 = vpop.xlane.xlu0 %872 }
 0x6f6   :  { %v881_v56 = vmul.f32 1.442695, %v878_v55  ;;  %v877_v57 = vsub.f32 %v863_v52, %v873_v21  ;;  %v1466_v21 = vld [vmem:[%s2131_s6] ss:$0 sm:$0xff] }
 0x6f7   :  { %v896_v58 = vpop.permute.xlu1 %895 }
 0x6f8   :  { %1689 = vpow2.f32 %v881_v56  ;;  %v879_v59 = vmul.f32 1.442695, %v877_v57  ;;  %1599 = vmatprep.subr.mxu0 %v896_v58  ;;  %v1467_v57 = vld [vmem:[%s2132_s7] ss:$0 sm:$0xff] }
 0x6f9   :  { %1600 = vmatpush3.msra.mxu0 %v896_v58 }
 0x6fa   :  { %1691 = vpow2.f32 %v879_v59 }
 0x6fb   :  { %v983_v20 = vpop.permute.xlu1 %982 }
 0x6fc   :  { %v1004_v25 = vsel %vm184_vm1, %v1978_v16, %v983_v20  ;;  %v1463_v16 = vld [vmem:[%s2130_s5] ss:$0 sm:$0xff] }
 0x6ff   :  { %v985_v22 = vpop.permute.xlu1 %984 }
 0x700   :  { %v1005_v27 = vsel %vm184_vm1, %v1976_v15, %v985_v22 }
 0x703   :  { %v993_v23 = vpop.permute.xlu1 %992 }
 0x704   :  { %v1007_v30 = vsel %vm270_vm2, %v1005_v27, %v993_v23 }
 0x705   :  { %v1690_v8 = vpop.eup %1689 }
 0x706   :  { %v886_v60 = vsel %vm270_vm2, %v1690_v8, 0.0 }
 0x707   :  { %v1692_v61 = vpop.eup %1691  ;;  %887 = vadd.xlane.f32.xlu0 %v886_v60 }
 0x708   :  { %v883_v62 = vsel %vm270_vm2, %v1692_v61, 0.0 }
 0x70b   :  { %884 = vadd.xlane.f32.xlu0 %v883_v62 }
 0x721   :  { %893 = vrot.lane.b32.xlu0 %v1914_v10, %s1793_s17  ;;  %v1014_v10 = vld [vmem:[%s2129_s4 + $0x18] sm:$0xff] }
 0x725   :  { %990 = vrot.lane.b32.xlu0 %v771_v48, %s1794_s18  ;;  %v1178_v48 = vld [vmem:[%s2134_s9 + $0x8] sm:$0xff] }
 0x790   :  { %v888_v63 = vpop.xlane.xlu0 %887 }
 0x791   :  { %1693 = vrcp.f32 %v888_v63 }
 0x794   :  { %v885_v0 = vpop.xlane.xlu0 %884 }
 0x795   :  { %1695 = vrcp.f32 %v885_v0 }
 0x798   :  { %v894_v1 = vpop.permute.xlu0 %893 }
 0x799   :  { %1601 = vmatprep.subr.mxu0 %v894_v1 }
 0x79a   :  { %1602 = vmatpush3.msra.mxu0 %v894_v1 }
 0x79b   :  { %1606 = vmatprep.subr.mxu0 %v1014_v10 }
 0x79c   :  { %v991_v24 = vpop.permute.xlu0 %990 }
 0x79d   :  { %v1006_v28 = vsel %vm270_vm2, %v1004_v25, %v991_v24 }
 0x79e   :  { %v1694_v3 = vpop.eup %1693 }
 0x79f   :  { %v892_v7 = vmul.f32 %v1694_v3, %v1690_v8  ;;  %v1468_v8 = vld [vmem:[%s2133_s8] ss:$0 sm:$0xff] }
 0x7a2   :  { %v1696_v4 = vpop.eup %1695 }
 0x7a3   :  { %v891_v6 = vmul.f32 %v1696_v4, %v1692_v61 }
 0x7a5   :  { %1603 = vmatprep.mubr.msk.f32.mxu0 %vm270_vm2, %v891_v6  ;;  %v1280_v6 = vld [vmem:[%s2136_s11 + $0x38] sm:$0xff] }
 0x7a6   :  { %1604 = vmatmul.mubr.msk.f32.vlgmr.msra.gmra.mxu0 %vm270_vm2, %v892_v7  ;;  %v1279_v7 = vld [vmem:[%s2136_s11 + $0x30] sm:$0xff] }
 0x7a7   :  { %1607 = vmatpush3.msra.mxu0 %v1014_v10  ;;  %v1278_v10 = vld [vmem:[%s2136_s11 + $0x28] sm:$0xff] }
 0x7a8   :  { %1608 = vmatprep.subr.mxu0 %v1013_v9 }
 0x7a9   :  { %1609 = vmatpush3.msra.mxu0 %v1013_v9  ;;  %v1277_v9 = vld [vmem:[%s2136_s11 + $0x20] sm:$0xff] }
 0x7aa   :  { %1610 = vmatprep.subr.mxu0 %v1012_v13 }
 0x7ab   :  { %1611 = vmatpush3.msra.mxu0 %v1012_v13  ;;  %v1276_v13 = vld [vmem:[%s2136_s11 + $0x18] sm:$0xff] }
 0x7ac   :  { %1612 = vmatprep.subr.mxu0 %v1011_v14 }
 0x7ad   :  { %1613 = vmatpush3.msra.mxu0 %v1011_v14  ;;  %v1275_v14 = vld [vmem:[%s2136_s11 + $0x10] sm:$0xff] }
 0x7ae   :  { %1628 = vmatprep.subr.mxu0 %v1280_v6 }
 0x866   :  { %v1605_v17 = vpop.f32.mrf.mxu0 }
 0x867   :  { %1000 = vrot.lane.b32.xlu1 %v1605_v17, %s1795_s26  ;;  %v1274_v17 = vld [vmem:[%s2136_s11 + $0x8] sm:$0xff] }
 0x868   :  { %v971_v18 = vpop.f32.mrf.mxu0 }
 0x869   :  { %998 = vrot.lane.b32.xlu0 %v971_v18, %s1795_s26  ;;  %v1273_v18 = vld [vmem:[%s2136_s11] sm:$0xff] }
 0x8d9   :  { %v1001_v26 = vpop.permute.xlu1 %1000 }
 0x8da   :  { %v1010_v32 = vsel %vm1008_vm3, %v1007_v30, %v1001_v26 }
 0x8db   :  { %v999_v29 = vpop.permute.xlu0 %998 }
 0x8dc   :  { %v1009_v31 = vsel %vm1008_vm3, %v1006_v28, %v999_v29  ;;  %v1471_v29 = vld [vmem:[%s2135_s10] ss:$0 sm:$0xff] }
 0x8dd   :  { %1614 = vmatprep.mubr.msk.f32.mxu0 %vm94_vm0, %v1009_v31 }
 0x8de   :  { %1615 = vmatmul.mubr.msk.f32.vlgmr.msra.gmra.mxu0 %vm94_vm0, %v1010_v32 }
 0x8df   :  { %1629 = vmatpush3.msra.mxu0 %v1280_v6 }
 0x8e0   :  { %1630 = vmatprep.subr.mxu0 %v1279_v7 }
 0x8e1   :  { %1631 = vmatpush3.msra.mxu0 %v1279_v7 }
 0x8e2   :  { %1632 = vmatprep.subr.mxu0 %v1278_v10 }
 0x8e3   :  { %1633 = vmatpush3.msra.mxu0 %v1278_v10 }
 0x8e4   :  { %1634 = vmatprep.subr.mxu0 %v1277_v9 }
 0x8e5   :  { %1635 = vmatpush3.msra.mxu0 %v1277_v9 }
 0x8e6   :  { %1636 = vmatprep.subr.mxu0 %v1276_v13 }
 0x8e7   :  { %1637 = vmatpush3.msra.mxu0 %v1276_v13 }
 0x8e8   :  { %1638 = vmatprep.subr.mxu0 %v1275_v14 }
 0x8e9   :  { %1639 = vmatpush3.msra.mxu0 %v1275_v14 }
 0x8ea   :  { %1640 = vmatprep.subr.mxu0 %v1274_v17 }
 0x8eb   :  { %1641 = vmatpush3.msra.mxu0 %v1274_v17 }
 0x8ec   :  { %1642 = vmatprep.subr.mxu0 %v1273_v18 }
 0x8ed   :  { %1643 = vmatpush3.msra.mxu0 %v1273_v18 }
 0x99e   :  { %v1616_v33 = vpop.f32.mrf.mxu0 }
 0x99f   :  { %v1100_v34 = vadd.f32 %v1616_v33, %v1463_v16 }
 0x9a0   :  { %v1094_v35 = vpop.f32.mrf.mxu0 }
 0x9a1   :  { %v1095_v36 = vadd.f32 %v1463_v16, %v1094_v35  ;;  %v1104_v15 = vadd.f32 %v1100_v34, %v1905_v5 }
 0x9a3   :  { %v1108_v37 = vsel %vm94_vm0, %v1104_v15, 0.0  ;;  %v1103_v12 = vadd.f32 %v1095_v36, %v1895_v2  ;;  %v1180_v2 = vld [vmem:[%s2134_s9 + $0x18] sm:$0xff]  ;;  %s1796_s9 = smov [#allocation7]  }
 0x9a4   :  { %1109 = vadd.xlane.f32.xlu1 %v1108_v37  ;;  %1617 = vmatprep.subr.mxu1 %v1180_v2  ;;  %s1423_s24 = sshll.u32 %s1796_s9, 4  ;;  %s1424_s24 = int_to_ptr.vmem [resolvable:$true] %s1423_s24 }
 0x9a5   :  { %v1105_v38 = vsel %vm94_vm0, %v1103_v12, 0.0  ;;  %1618 = vmatpush3.msra.mxu1 %v1180_v2  ;;  %s1753_s6 = scalar_lea.vmem %s1424_s24, 256  ;;  %p1758_p11 = scmp.lt.s32.totalorder %s1424_s24, %s1424_s24 }
 0x9a6   :  { %1106 = vadd.xlane.f32.xlu0 %v1105_v38  ;;  %1619 = vmatprep.subr.mxu1 %v1179_v47  ;;  %p1754_p10 = scmp.ne.s32.totalorder %s1424_s24, %s1753_s6  ;;  %p1759_p12 = scmp.lt.s32.totalorder %s1753_s6, %s1753_s6 }
 0x9a7   :  { %1620 = vmatpush3.msra.mxu1 %v1179_v47 }
 0x9a8   :  { %1621 = vmatprep.subr.mxu1 %v1178_v48  ;;  %p1760_p13 = por %p1759_p12, %p1758_p11 }
 0x9a9   :  { %1622 = vmatpush3.msra.mxu1 %v1178_v48 }
 0x9aa   :  { %1623 = vmatprep.subr.mxu1 %v1177_v49  ;;  %p1761_p0 = pnand %p1760_p13, %p1754_p10 }
 0x9ab   :  { %1624 = vmatpush3.msra.mxu1 %v1177_v49 }
 0xa2d   :  { %v1110_v39 = vpop.xlane.xlu1 %1109 }
 0xa2e   :  { %v1113_v40 = vmul.f32 0.03125, %v1110_v39 }
 0xa2f   :  { %v1107_v41 = vpop.xlane.xlu0 %1106 }
 0xa30   :  { %v1112_v42 = vmul.f32 0.03125, %v1107_v41  ;;  %v1115_v43 = vsub.f32 %v1104_v15, %v1113_v40 }
 0xa32   :  { %v1114_v44 = vsub.f32 %v1103_v12, %v1112_v42  ;;  %v1117_v46 = vmul.f32 %v1115_v43, %v1115_v43  ;;  %v1474_v12 = vld [vmem:[%s2137_s12] ss:$0 sm:$0xff] }
 0xa34   :  { %v1116_v45 = vmul.f32 %v1114_v44, %v1114_v44  ;;  %v1121_v5 = vsel %vm94_vm0, %v1117_v46, 0.0 }
 0xa36   :  { %v1118_v11 = vsel %vm94_vm0, %v1116_v45, 0.0 }
 0xa37   :  { %1119 = vadd.xlane.f32.xlu0 %v1118_v11 }
 0xa3b   :  { %1122 = vadd.xlane.f32.xlu0 %v1121_v5 }
 0xac0   :  { %v1120_v50 = vpop.xlane.xlu0 %1119 }
 0xac1   :  { %v1124_v51 = vmul.f32 0.03125, %v1120_v50 }
 0xac3   :  { %v1126_v52 = vadd.f32 1e-05, %v1124_v51 }
 0xac4   :  { %v1123_v53 = vpop.xlane.xlu0 %1122 }
 0xac5   :  { %1697 = vrsqrt.f32 %v1126_v52  ;;  %v1125_v54 = vmul.f32 0.03125, %v1123_v53 }
 0xac7   :  { %v1127_v19 = vadd.f32 1e-05, %v1125_v54 }
 0xac9   :  { %1699 = vrsqrt.f32 %v1127_v19 }
 0xad2   :  { %v1698_v55 = vpop.eup %1697 }
 0xad3   :  { %v1130_v56 = vmul.f32 %v1698_v55, %v1114_v44 }
 0xad5   :  { %v1139_v58 = vmul.f32 %v1466_v21, %v1130_v56 }
 0xad6   :  { %v1700_v59 = vpop.eup %1699 }
 0xad7   :  { %v1131_v60 = vmul.f32 %v1700_v59, %v1115_v43  ;;  %v2068_v61 = vadd.f32 %v1467_v57, %v1139_v58  ;;  %v1477_v58 = vld [vmem:[%s2138_s13] ss:$0 sm:$0xff] }
 0xad9   :  { %v1140_v62 = vmul.f32 %v1466_v21, %v1131_v60  ;;  %1625 = vmatprep.mubr.msk.f32.mxu1 %vm94_vm0, %v2068_v61  ;;  %v1157_v63 = vmul.f32 %v1468_v8, %v2068_v61  ;;  %v1478_v60 = vld [vmem:[%s2139_s14] ss:$0 sm:$0xff] }
 0xadb   :  { %v1149_v0 = vadd.f32 %v1467_v57, %v1140_v62  ;;  %v1159_v1 = vsel %vm94_vm0, %v1157_v63, 0.0 }
 0xadc   :  { %1160 = vadd.xlane.f32.xlu1 %v1159_v1 }
 0xadd   :  { %1626 = vmatmul.mubr.msk.f32.vlgmr.msra.gmra.mxu1 %vm94_vm0, %v1149_v0  ;;  %v1158_v3 = vmul.f32 %v1468_v8, %v1149_v0 }
 0xadf   :  { %v1162_v4 = vsel %vm94_vm0, %v1158_v3, 0.0 }
 0xae0   :  { %1163 = vadd.xlane.f32.xlu0 %v1162_v4 }
 0xb65   :  { %v1161_v22 = vpop.xlane.xlu1 %1160 }
 0xb66   :  { %v1469_v24 = vmul.f32 -1.442695, %v1161_v22 }
 0xb69   :  { %v1164_v20 = vpop.xlane.xlu0 %1163 }
 0xb6a   :  { %v1470_v23 = vmul.f32 -1.442695, %v1164_v20 }
 0xb6c   :  { %1701 = vpow2.f32 %v1470_v23 }
 0xb6d   :  { %1703 = vpow2.f32 %v1469_v24 }
 0xb79   :  { %v1702_v25 = vpop.eup %1701 }
 0xb7a   :  { %v1704_v26 = vpop.eup %1703  ;;  %v1172_v27 = vadd.f32 1.0, %v1702_v25 }
 0xb7b   :  { %v1171_v28 = vadd.f32 1.0, %v1704_v26 }
 0xb7c   :  { %1705 = vrcp.f32 %v1172_v27 }
 0xb7d   :  { %1707 = vrcp.f32 %v1171_v28 }
 0xb89   :  { %v1706_v16 = vpop.eup %1705 }
 0xb8a   :  { %v1708_v34 = vpop.eup %1707 }
 0xb9d   :  { %v1627_v30 = vpop.f32.mrf.mxu1 }
 0xb9e   :  { %v1266_v31 = vadd.f32 %v1627_v30, %v1471_v29 }
 0xb9f   :  { %v1260_v32 = vpop.f32.mrf.mxu1 }
 0xba0   :  { %v1261_v33 = vadd.f32 %v1471_v29, %v1260_v32  ;;  %v1270_v35 = vmul.f32 %v1706_v16, %v1266_v31 }
 0xba2   :  { %v1269_v36 = vmul.f32 %v1708_v34, %v1261_v33  ;;  %v1272_v37 = vmax.f32 %v1270_v35, 0.0 }
 0xba4   :  { %v1271_v15 = vmax.f32 %v1269_v36, 0.0 }
 0xba6   :  { %1644 = vmatprep.mubr.msk.f32.mxu0 %vm1288_vm4, %v1271_v15 }
 0xba7   :  { %1645 = vmatmul.mubr.msk.f32.vlgmr.msra.gmra.mxu0 %vm1288_vm4, %v1272_v37 }
 0xc67   :  { %v1646_v38 = vpop.f32.mrf.mxu0 }
 0xc68   :  { %v1367_v39 = vadd.f32 %v1646_v38, %v1474_v12 }
 0xc69   :  { %v1361_v40 = vpop.f32.mrf.mxu0 }
 0xc6a   :  { %v1362_v41 = vadd.f32 %v1474_v12, %v1361_v40  ;;  %v1371_v42 = vadd.f32 %v1367_v39, %v1149_v0 }
 0xc6c   :  { %v1375_v43 = vsel %vm94_vm0, %v1371_v42, 0.0  ;;  %v1370_v44 = vadd.f32 %v1362_v41, %v2068_v61 }
 0xc6d   :  { %1376 = vadd.xlane.f32.xlu0 %v1375_v43 }
 0xc6e   :  { %v1372_v45 = vsel %vm94_vm0, %v1370_v44, 0.0 }
 0xc6f   :  { %1373 = vadd.xlane.f32.xlu1 %v1372_v45 }
 0xcf6   :  { %v1377_v11 = vpop.xlane.xlu0 %1376 }
 0xcf7   :  { %v1379_v46 = vmul.f32 0.03125, %v1377_v11 }
 0xcf8   :  { %v1374_v5 = vpop.xlane.xlu1 %1373 }
 0xcf9   :  { %v1381_v2 = vsub.f32 %v1371_v42, %v1379_v46  ;;  %v1378_v47 = vmul.f32 0.03125, %v1374_v5 }
 0xcfb   :  { %v1380_v48 = vsub.f32 %v1370_v44, %v1378_v47  ;;  %v1383_v49 = vmul.f32 %v1381_v2, %v1381_v2 }
 0xcfd   :  { %v1387_v50 = vsel %vm94_vm0, %v1383_v49, 0.0  ;;  %v1382_v51 = vmul.f32 %v1380_v48, %v1380_v48 }
 0xcfe   :  { %1388 = vadd.xlane.f32.xlu0 %v1387_v50 }
 0xcff   :  { %v1384_v52 = vsel %vm94_vm0, %v1382_v51, 0.0 }
 0xd00   :  { %1385 = vadd.xlane.f32.xlu1 %v1384_v52 }
 0xd87   :  { %v1389_v53 = vpop.xlane.xlu0 %1388 }
 0xd88   :  { %v1391_v54 = vmul.f32 0.03125, %v1389_v53 }
 0xd89   :  { %v1386_v19 = vpop.xlane.xlu1 %1385 }
 0xd8a   :  { %v1393_v55 = vadd.f32 1e-05, %v1391_v54  ;;  %v1390_v21 = vmul.f32 0.03125, %v1386_v19 }
 0xd8c   :  { %1709 = vrsqrt.f32 %v1393_v55  ;;  %v1392_v56 = vadd.f32 1e-05, %v1390_v21 }
 0xd8e   :  { %1711 = vrsqrt.f32 %v1392_v56 }
 0xd99   :  { %v1710_v57 = vpop.eup %1709 }
 0xd9a   :  { %v1397_v59 = vmul.f32 %v1710_v57, %v1381_v2 }
 0xd9b   :  { %v1712_v8 = vpop.eup %1711 }
 0xd9c   :  { %v1396_v61 = vmul.f32 %v1712_v8, %v1380_v48  ;;  %v1406_v62 = vmul.f32 %v1477_v58, %v1397_v59 }
 0xd9e   :  { %v1405_v63 = vmul.f32 %v1477_v58, %v1396_v61  ;;  %v1415_v0 = vadd.f32 %v1478_v60, %v1406_v62 }
 0xda0   :  { %v1414_v1 = vadd.f32 %v1478_v60, %v1405_v63  ;;  %1417 = vst.msk [vmem:[#allocation7 + $0x8] sm:$0xff] %vm94_vm0, %v1415_v0 }
 0xda2   :  { %1416 = vst.msk [vmem:[#allocation7] sm:$0xff] %vm94_vm0, %v1414_v1 }
 0xda3   :  { %1764 = shalt.err (!%p1761_p0)
}
 0xda4   :  { %1429 = dma.vmem_to_hbm [thread:$0]  %s1424_s24, 256, %s2140_s15, [#allocation4], %s1780_s21, %s1780_s21, %s1781_s22  }
 0xda5   :  { %1777 = dma.done.wait [#allocation4], 256  }
 0xda6   :  { %1778 = vsyncadd [#allocation4], 4294967040 }
 0xda7   :  { %1433 = vsyncpa [#allocation3], 1 }
 0xda8   :  { %1434 = vsyncpa [#allocation6], 1 }
 0xda9   :  { %1435 = vsyncpa [#allocation4], 1 }

</bundles_post_ra>
